<compile_context>
chip_gen: v6e
topology: v6e:2x2x1
jax: 0.10.0
libtpu: 0.0.40
codegen_flags: <defaults>
</compile_context>

<pallas_src>
import functools

import jax
import jax.numpy as jnp
from jax import lax
from jax.experimental import pallas as pl
from jax.experimental.pallas import tpu as pltpu


def attention_pooling_kernel(qv_ref, w_ref, p_ref, pool_ref, out_ref, *,
                             n_blk, cv):
    # qv_ref  : (n_blk, Cv+Cq, T)  bf16, pixels (tile_h rows * W) on lanes,
    #           channels on sublanes, VALUE channels first.
    # w_ref   : (F, Cv+Cq)         bf16, fused [wk | wq] 1x1-conv weight.
    # p_ref   : (F, 3)             f32: col0 gate bias, col1 att weight, col2 att bias.
    # pool_ref: (T, T_out)         f32, row-local block-diagonal averaging matrix.
    # out_ref : (n_blk, Cv, T_out) f32, already NCHW-ordered.
    w = w_ref[...]
    gate_b = p_ref[:, 0:1]          # (F, 1)
    att_w = p_ref[:, 1:2]           # (F, 1)
    att_b = p_ref[0:1, 2:3]         # (1, 1)
    pool = pool_ref[...]            # (T, T_out)

    def body(i, carry):
        qv = qv_ref[i]                                       # (Cv+Cq, T) bf16
        v = qv[:cv, :].astype(jnp.float32)                   # (Cv, T) f32

        # Fused 1x1 convs: one bf16 MXU matmul, f32 accumulation.
        pre = jnp.dot(w, qv, preferred_element_type=jnp.float32) + gate_b
        gated = jax.nn.sigmoid(pre)                          # (F, T), EUP in f32

        # att: 1x1 conv down to 1 channel -> VPU mul + sublane (XLU) reduction
        # instead of an MXU matmul with a 1-wide output column.
        att = jax.nn.sigmoid(
            jnp.sum(gated * att_w, axis=0, keepdims=True) + att_b)   # (1, T)

        weighted = att * v                                   # (Cv, T) f32

        # AvgPool2d(kernel=(1, channels), stride=(1, channels)) over this row
        # tile: exact, row-local matmul against the small pooling block.
        out_ref[i] = jnp.dot(weighted, pool,
                             preferred_element_type=jnp.float32
                             ).astype(out_ref.dtype)
        return carry

    lax.fori_loop(0, n_blk, body, 0, unroll=True)


def _choose_tiling(N, H, W, W_out):
    """Pick (tile_h, n_blk).

    tile_h : rows of the image per block.  Prefer divisors of H whose output
             lane extent (tile_h*W_out) is a multiple of 128 (lane-dense,
             (8,128)-legal blocks) and whose pooling matrix stays small.
    n_blk  : images per grid step (amortizes per-step overhead when images are
             tiny).
    """
    MAX_LANES = 2048           # per-block pixel (lane) budget
    POOL_BYTES_MAX = 4 << 20   # cap on the per-tile pooling matrix (f32)
    TARGET_LANES = 1024        # ~85%-of-roofline sweet spot

    cands = [t for t in range(1, H + 1)
             if H % t == 0
             and (t * W_out) % 128 == 0
             and t * W <= MAX_LANES
             and (t * W) * (t * W_out) * 4 <= POOL_BYTES_MAX]
    if not cands and H * W > MAX_LANES:
        # Large image with no 128-aligned row tile: relax lane alignment but
        # keep VMEM / pool-matrix caps (still row-exact).
        cands = [t for t in range(1, H + 1)
                 if H % t == 0 and t * W <= MAX_LANES
                 and (t * W) * (t * W_out) * 4 <= POOL_BYTES_MAX]
    tile_h = max(cands) if cands else H   # fallback: whole image (full dims are legal)

    n_blk = 1
    if tile_h == H:
        # Small images: batch several per grid step, unrolled loop in-kernel.
        n_blk = max(1, min(8, TARGET_LANES // max(H * W, 1)))
        n_blk = max(d for d in range(1, N + 1) if N % d == 0 and d <= n_blk)
    return tile_h, n_blk


@functools.partial(jax.jit, static_argnames=("channels",))
def attention_pooling(query, value, wq, wk, gate_b, att_w, att_b, channels):
    """query: (N, Cq, H, W), value: (N, Cv, H, W) -- NCHW like PyTorch.
    Returns (N, Cv, H, W // channels) in float32."""
    N, Cq, H, W = query.shape
    Cv = value.shape[1]
    F = wq.shape[0]
    assert W % channels == 0, "W must be divisible by pooling width (channels)"
    W_out = W // channels
    C = Cq + Cv

    tile_h, n_blk = _choose_tiling(N, H, W, W_out)
    T = tile_h * W
    T_out = tile_h * W_out

    # Pre-concatenated bf16 MXU operand: [value; query] along channels, pixels
    # flattened onto the lane axis.  Single fused cast+concat+reshape pass, no
    # HBM transpose.  Value channels first so `v` is an aligned sublane-prefix
    # slice inside the kernel.
    qv = jnp.concatenate(
        [value.astype(jnp.bfloat16), query.astype(jnp.bfloat16)],
        axis=1).reshape(N, C, H * W)
    w_fused = jnp.concatenate(
        [wk.reshape(F, Cv), wq.reshape(F, Cq)], axis=1).astype(jnp.bfloat16)

    # Tiny per-filter params packed into one (F, 3) f32 block (one DMA stream,
    # one padded (8,128) tile).
    params = jnp.stack(
        [gate_b.reshape(F).astype(jnp.float32),
         att_w.reshape(F).astype(jnp.float32),
         jnp.broadcast_to(att_b.astype(jnp.float32).reshape(()), (F,))],
        axis=1)                                                  # (F, 3)

    # Row-local averaging matrix for ONE tile of tile_h rows (block-diagonal
    # within the tile).  Constant index_map -> fetched into VMEM once.
    pool_w = (jnp.arange(W)[:, None] // channels ==
              jnp.arange(W_out)[None, :]).astype(jnp.float32) / channels
    pool_mat = jnp.kron(jnp.eye(tile_h, dtype=jnp.float32), pool_w)  # (T, T_out)

    kernel = functools.partial(attention_pooling_kernel, n_blk=n_blk, cv=Cv)

    # Per-step VMEM (double-buffered inputs/outputs):
    #   2 * n_blk*C*T*2B (qv) + T*T_out*4B (pool, once) + 2 * n_blk*Cv*T_out*4B
    # -- a few hundred KiB .. few MiB for the tile caps above; fits every
    # generation's default scoped VMEM limit, so no vmem_limit_bytes override.
    out = pl.pallas_call(
        kernel,
        out_shape=jax.ShapeDtypeStruct((N, Cv, H * W_out), jnp.float32),
        grid=(N // n_blk, H // tile_h),
        in_specs=[
            pl.BlockSpec((n_blk, C, T), lambda b, r: (b, 0, r)),     # qv (bf16)
            pl.BlockSpec((F, C), lambda b, r: (0, 0)),               # fused weights
            pl.BlockSpec((F, 3), lambda b, r: (0, 0)),               # packed params
            pl.BlockSpec((T, T_out), lambda b, r: (0, 0)),           # pool tile
        ],
        out_specs=pl.BlockSpec((n_blk, Cv, T_out), lambda b, r: (b, 0, r)),
        compiler_params=pltpu.CompilerParams(
            dimension_semantics=("parallel", "parallel")),
    )(qv, w_fused, params, pool_mat)

    # (N, Cv, H*W_out) -> (N, Cv, H, W_out): free reshape, already NCHW.
    return out.reshape(N, Cv, H, W_out)


def attention_pooling_ref(query, value, wq, wk, gate_b, att_w, att_b, channels):
    """Pure-JAX reference mirroring the PyTorch forward (correctness check)."""
    att_q = jnp.einsum('fc,nchw->nfhw', wq, query)
    att_k = jnp.einsum('fc,nchw->nfhw', wk, value)
    gated = jax.nn.sigmoid(att_q + att_k + gate_b[None, :, None, None])
    att = jax.nn.sigmoid(jnp.einsum('of,nfhw->nohw', att_w, gated)
                         + att_b[None, :, None, None])
    weighted = att * value
    N, Cv, H, W = weighted.shape
    return weighted.reshape(N, Cv, H, W // channels, channels).mean(axis=-1)


if __name__ == "__main__":
    # Small, module-consistent shapes: input_filters=[4, 6], filters=8,
    # channels (pool width)=4, H=6, W=8 (-> W_out=2).
    N, Cq, Cv, F, H, channels = 2, 4, 6, 8, 6, 4
    W = channels * 2

    key = jax.random.PRNGKey(0)
    k1, k2, k3, k4, k5, k6, k7 = jax.random.split(key, 7)
    query = jax.random.normal(k1, (N, Cq, H, W), dtype=jnp.float32)
    value = jax.random.normal(k2, (N, Cv, H, W), dtype=jnp.float32)

    # 1x1 conv weights (no bias) for att_q / att_k; gate/att params are
    # nominally zeros/ones at init but kept general since they stay trainable.
    wq = jax.random.uniform(k3, (F, Cq), jnp.float32, -1.0, 1.0) / jnp.sqrt(float(Cq))
    wk = jax.random.uniform(k4, (F, Cv), jnp.float32, -1.0, 1.0) / jnp.sqrt(float(Cv))
    gate_b = 0.1 * jax.random.normal(k5, (F,), jnp.float32)
    att_w = jnp.ones((1, F), jnp.float32) + 0.1 * jax.random.normal(k6, (1, F), jnp.float32)
    att_b = 0.1 * jax.random.normal(k7, (1,), jnp.float32)

    out = attention_pooling(query, value, wq, wk, gate_b, att_w, att_b, channels)
    out = jax.block_until_ready(out)
    assert out.shape == (N, Cv, H, W // channels), out.shape

    # Tight check: reference computed on the same bf16-quantized MXU operands
    # (the only precision the kernel intentionally drops).
    f32 = jnp.float32
    q_q = query.astype(jnp.bfloat16).astype(f32)
    v_q = value.astype(jnp.bfloat16).astype(f32)
    wq_q = wq.astype(jnp.bfloat16).astype(f32)
    wk_q = wk.astype(jnp.bfloat16).astype(f32)
    ref_q = attention_pooling_ref(q_q, v_q, wq_q, wk_q, gate_b, att_w, att_b, channels)
    assert jnp.allclose(out, ref_q, atol=1e-4, rtol=1e-4), \
        "mismatch vs quantized-input reference"

    # Loose sanity check against the full-f32 reference (difference is only
    # the bf16 rounding of the q/v/weight MXU operands).
    ref = attention_pooling_ref(query, value, wq, wk, gate_b, att_w, att_b, channels)
    assert jnp.allclose(out, ref, atol=1e-1, rtol=1e-1), "mismatch vs f32 reference"

    print("KERNEL_OK")
</pallas_src>

<mosaic_0001>
module attributes {stable_mosaic.version = 11 : i64} {
  func.func @attention_pooling_kernel(%arg0: i32, %arg1: i32, %arg2: memref<2x10x48xbf16, #tpu.memory_space<vmem>>, %arg3: memref<8x10xbf16, #tpu.memory_space<vmem>>, %arg4: memref<8x3xf32, #tpu.memory_space<vmem>>, %arg5: memref<48x12xf32, #tpu.memory_space<vmem>>, %arg6: memref<2x6x12xf32, #tpu.memory_space<vmem>>) attributes {dimension_semantics = [#tpu.dimension_semantics<parallel>, #tpu.dimension_semantics<parallel>], iteration_bounds = array<i64: 1, 1>, scalar_prefetch = 0 : i64, scratch_operands = 0 : i64, tpu.core_type = #tpu.core_type<tc>, window_params = [{transform_indices = @transform_0, window_bounds = array<i64: 2, 10, 48>}, {pipeline_mode = #tpu.pipeline_mode<synchronous>, transform_indices = @transform_1, window_bounds = array<i64: 8, 10>}, {pipeline_mode = #tpu.pipeline_mode<synchronous>, transform_indices = @transform_2, window_bounds = array<i64: 8, 3>}, {pipeline_mode = #tpu.pipeline_mode<synchronous>, transform_indices = @transform_3, window_bounds = array<i64: 48, 12>}, {transform_indices = @transform_4, window_bounds = array<i64: 2, 6, 12>}]} {
    %c0 = arith.constant 0 : index
    %c0_0 = arith.constant 0 : index
    %0 = vector.load %arg3[%c0, %c0_0] : memref<8x10xbf16, #tpu.memory_space<vmem>>, vector<8x10xbf16>
    %c0_1 = arith.constant 0 : index
    %c0_2 = arith.constant 0 : index
    %1 = vector.load %arg4[%c0_1, %c0_2] : memref<8x3xf32, #tpu.memory_space<vmem>>, vector<8x1xf32>
    %c0_3 = arith.constant 0 : index
    %c1 = arith.constant 1 : index
    %2 = vector.load %arg4[%c0_3, %c1] : memref<8x3xf32, #tpu.memory_space<vmem>>, vector<8x1xf32>
    %c0_4 = arith.constant 0 : index
    %c2 = arith.constant 2 : index
    %3 = vector.load %arg4[%c0_4, %c2] : memref<8x3xf32, #tpu.memory_space<vmem>>, vector<1x1xf32>
    %c0_5 = arith.constant 0 : index
    %c0_6 = arith.constant 0 : index
    %4 = vector.load %arg5[%c0_5, %c0_6] : memref<48x12xf32, #tpu.memory_space<vmem>>, vector<48x12xf32>
    %c0_i32 = arith.constant 0 : i32
    %5 = arith.index_cast %c0_i32 : i32 to index
    %c0_7 = arith.constant 0 : index
    %c0_8 = arith.constant 0 : index
    %6 = vector.load %arg2[%5, %c0_7, %c0_8] : memref<2x10x48xbf16, #tpu.memory_space<vmem>>, vector<1x10x48xbf16>
    %7 = vector.shape_cast %6 : vector<1x10x48xbf16> to vector<10x48xbf16>
    %8 = vector.extract_strided_slice %7 {offsets = [0, 0], sizes = [6, 48], strides = [1, 1]} : vector<10x48xbf16> to vector<6x48xbf16>
    %9 = arith.extf %8 : vector<6x48xbf16> to vector<6x48xf32>
    %cst = arith.constant dense<0.000000e+00> : vector<8x48xf32>
    %10 = tpu.matmul %0, %7, %cst {dimension_numbers = #tpu.dot_dimension_numbers<[1], [0], [0], [1], [0, 0, 1, 1], [], []>} : vector<8x10xbf16>, vector<10x48xbf16>, vector<8x48xf32> -> vector<8x48xf32>
    %11 = vector.broadcast %1 : vector<8x1xf32> to vector<8x48xf32>
    %12 = arith.addf %10, %11 : vector<8x48xf32>
    %13 = arith.negf %12 : vector<8x48xf32>
    %14 = math.exp %13 : vector<8x48xf32>
    %cst_9 = arith.constant 1.000000e+00 : f32
    %15 = vector.broadcast %cst_9 : f32 to vector<8x48xf32>
    %16 = arith.addf %15, %14 : vector<8x48xf32>
    %17 = arith.divf %15, %16 : vector<8x48xf32>
    %18 = vector.broadcast %2 : vector<8x1xf32> to vector<8x48xf32>
    %19 = arith.mulf %17, %18 : vector<8x48xf32>
    %cst_10 = arith.constant dense<0.000000e+00> : vector<48xf32>
    %20 = vector.multi_reduction <add>, %19, %cst_10 [0] : vector<8x48xf32> to vector<48xf32>
    %21 = vector.shape_cast %20 : vector<48xf32> to vector<1x48xf32>
    %22 = vector.broadcast %3 : vector<1x1xf32> to vector<1x48xf32>
    %23 = arith.addf %21, %22 : vector<1x48xf32>
    %24 = arith.negf %23 : vector<1x48xf32>
    %25 = math.exp %24 : vector<1x48xf32>
    %cst_11 = arith.constant 1.000000e+00 : f32
    %26 = vector.broadcast %cst_11 : f32 to vector<1x48xf32>
    %27 = arith.addf %26, %25 : vector<1x48xf32>
    %28 = arith.divf %26, %27 : vector<1x48xf32>
    %29 = vector.broadcast %28 : vector<1x48xf32> to vector<6x48xf32>
    %30 = arith.mulf %29, %9 : vector<6x48xf32>
    %cst_12 = arith.constant dense<0.000000e+00> : vector<6x12xf32>
    %31 = tpu.matmul %30, %4, %cst_12 {dimension_numbers = #tpu.dot_dimension_numbers<[1], [0], [0], [1], [0, 0, 1, 1], [], []>} : vector<6x48xf32>, vector<48x12xf32>, vector<6x12xf32> -> vector<6x12xf32>
    %32 = arith.index_cast %c0_i32 : i32 to index
    %c0_13 = arith.constant 0 : index
    %c0_14 = arith.constant 0 : index
    %33 = vector.load %arg6[%32, %c0_13, %c0_14] : memref<2x6x12xf32, #tpu.memory_space<vmem>>, vector<1x6x12xf32>
    %34 = vector.shape_cast %33 : vector<1x6x12xf32> to vector<6x12xf32>
    %35 = vector.shape_cast %31 : vector<6x12xf32> to vector<1x6x12xf32>
    tpu.vector_store %arg6[%32, %c0_13, %c0_14], %35 {strides = array<i32>} : memref<2x6x12xf32, #tpu.memory_space<vmem>>, vector<1x6x12xf32>,
    %c1_i32 = arith.constant 1 : i32
    %36 = arith.index_cast %c1_i32 : i32 to index
    %c0_15 = arith.constant 0 : index
    %c0_16 = arith.constant 0 : index
    %37 = vector.load %arg2[%36, %c0_15, %c0_16] : memref<2x10x48xbf16, #tpu.memory_space<vmem>>, vector<1x10x48xbf16>
    %38 = vector.shape_cast %37 : vector<1x10x48xbf16> to vector<10x48xbf16>
    %39 = vector.extract_strided_slice %38 {offsets = [0, 0], sizes = [6, 48], strides = [1, 1]} : vector<10x48xbf16> to vector<6x48xbf16>
    %40 = arith.extf %39 : vector<6x48xbf16> to vector<6x48xf32>
    %cst_17 = arith.constant dense<0.000000e+00> : vector<8x48xf32>
    %41 = tpu.matmul %0, %38, %cst_17 {dimension_numbers = #tpu.dot_dimension_numbers<[1], [0], [0], [1], [0, 0, 1, 1], [], []>} : vector<8x10xbf16>, vector<10x48xbf16>, vector<8x48xf32> -> vector<8x48xf32>
    %42 = vector.broadcast %1 : vector<8x1xf32> to vector<8x48xf32>
    %43 = arith.addf %41, %42 : vector<8x48xf32>
    %44 = arith.negf %43 : vector<8x48xf32>
    %45 = math.exp %44 : vector<8x48xf32>
    %cst_18 = arith.constant 1.000000e+00 : f32
    %46 = vector.broadcast %cst_18 : f32 to vector<8x48xf32>
    %47 = arith.addf %46, %45 : vector<8x48xf32>
    %48 = arith.divf %46, %47 : vector<8x48xf32>
    %49 = vector.broadcast %2 : vector<8x1xf32> to vector<8x48xf32>
    %50 = arith.mulf %48, %49 : vector<8x48xf32>
    %cst_19 = arith.constant dense<0.000000e+00> : vector<48xf32>
    %51 = vector.multi_reduction <add>, %50, %cst_19 [0] : vector<8x48xf32> to vector<48xf32>
    %52 = vector.shape_cast %51 : vector<48xf32> to vector<1x48xf32>
    %53 = vector.broadcast %3 : vector<1x1xf32> to vector<1x48xf32>
    %54 = arith.addf %52, %53 : vector<1x48xf32>
    %55 = arith.negf %54 : vector<1x48xf32>
    %56 = math.exp %55 : vector<1x48xf32>
    %cst_20 = arith.constant 1.000000e+00 : f32
    %57 = vector.broadcast %cst_20 : f32 to vector<1x48xf32>
    %58 = arith.addf %57, %56 : vector<1x48xf32>
    %59 = arith.divf %57, %58 : vector<1x48xf32>
    %60 = vector.broadcast %59 : vector<1x48xf32> to vector<6x48xf32>
    %61 = arith.mulf %60, %40 : vector<6x48xf32>
    %cst_21 = arith.constant dense<0.000000e+00> : vector<6x12xf32>
    %62 = tpu.matmul %61, %4, %cst_21 {dimension_numbers = #tpu.dot_dimension_numbers<[1], [0], [0], [1], [0, 0, 1, 1], [], []>} : vector<6x48xf32>, vector<48x12xf32>, vector<6x12xf32> -> vector<6x12xf32>
    %63 = arith.index_cast %c1_i32 : i32 to index
    %c0_22 = arith.constant 0 : index
    %c0_23 = arith.constant 0 : index
    %64 = vector.load %arg6[%63, %c0_22, %c0_23] : memref<2x6x12xf32, #tpu.memory_space<vmem>>, vector<1x6x12xf32>
    %65 = vector.shape_cast %64 : vector<1x6x12xf32> to vector<6x12xf32>
    %66 = vector.shape_cast %62 : vector<6x12xf32> to vector<1x6x12xf32>
    tpu.vector_store %arg6[%63, %c0_22, %c0_23], %66 {strides = array<i32>} : memref<2x6x12xf32, #tpu.memory_space<vmem>>, vector<1x6x12xf32>,
    %c2_i32 = arith.constant 2 : i32
    return
  }
  func.func @transform_0(%arg0: i32, %arg1: i32) -> (i32, i32, i32) {
    %c0_i32 = arith.constant 0 : i32
    %c0_i32_0 = arith.constant 0 : i32
    return %arg0, %c0_i32, %arg1 : i32, i32, i32
  }
  func.func @transform_1(%arg0: i32, %arg1: i32) -> (i32, i32) {
    %c0_i32 = arith.constant 0 : i32
    %c0_i32_0 = arith.constant 0 : i32
    %c0_i32_1 = arith.constant 0 : i32
    return %c0_i32, %c0_i32_0 : i32, i32
  }
  func.func @transform_2(%arg0: i32, %arg1: i32) -> (i32, i32) {
    %c0_i32 = arith.constant 0 : i32
    %c0_i32_0 = arith.constant 0 : i32
    %c0_i32_1 = arith.constant 0 : i32
    return %c0_i32, %c0_i32_0 : i32, i32
  }
  func.func @transform_3(%arg0: i32, %arg1: i32) -> (i32, i32) {
    %c0_i32 = arith.constant 0 : i32
    %c0_i32_0 = arith.constant 0 : i32
    %c0_i32_1 = arith.constant 0 : i32
    return %c0_i32, %c0_i32_0 : i32, i32
  }
  func.func @transform_4(%arg0: i32, %arg1: i32) -> (i32, i32, i32) {
    %c0_i32 = arith.constant 0 : i32
    %c0_i32_0 = arith.constant 0 : i32
    return %arg0, %c0_i32, %arg1 : i32, i32, i32
  }
}

</mosaic_0001>

<bundles_post_ra>
// kernel: attention_pooling.1
= control target key start
LH: loop header
LB: loop body
LE: loop exit
PB: predicated region body
PF: predicated region fallthrough
CT: control target
= control target key end

     0   :  { %vm44_vm0 = vcmask 1044480   ;;  %v456_v0 = vmov 0.0   ;;  %vm457_vm1 = vmmov 0   ;;  %v458_v8 = vmov 0   ;;  %s549_s0 = inlined_call_operand.vmem [shape: bf16[2,10,48], index: 0, kind: input, shape index: {}]   ;;  %s550_s2 = inlined_call_operand.vmem [shape: f32[8,3], index: 2, kind: input, shape index: {}]   ;;  %s551_s1 = inlined_call_operand.vmem [shape: bf16[8,10], index: 1, kind: input, shape index: {}]   ;;  %s552_s3 = inlined_call_operand.vmem [shape: f32[48,12], index: 3, kind: input, shape index: {}]   ;;  %s553_s4 = inlined_call_operand.vmem [shape: f32[2,6,12], index: 4, kind: output, shape index: {}]  }
   0x1   :  { %387 = vmatprep.subr.bf16.mxu1 %v456_v0  ;;  %408 = vmatprep.subr.bf16.mxu0 %v456_v0  ;;  %v489_v1 = vld [vmem:[%s549_s0] sm:$0xf]  ;;  %v28_v2 = vld [vmem:[%s549_s0 + $0x4] sm:$0x1]  ;;  %v497_v3 = vld [vmem:[%s549_s0 + $0x8] sm:$0xf] }
   0x2   :  { %v356_v4 = vcombine.low %v489_v1, %v28_v2  ;;  %v362_v5 = vld [vmem:[%s549_s0 + $0xc] sm:$0x1]  ;;  %389 = vmatprep.mubr.msk.bf16.mxu1 %vm457_vm1, %v456_v0  ;;  %410 = vmatprep.mubr.msk.bf16.mxu0 %vm457_vm1, %v456_v0  ;;  %v19_v6 = vld [vmem:[%s550_s2] sm:$0xff]  ;;  %v459_v11 = vmov 2   ;;  %vm40_vm2 = vcmask 80896   ;;  %v460_v14 = vmov 1  }
   0x3   :  { %v363_v7 = vcombine.low %v497_v3, %v362_v5  ;;  %434 = vset.pattern.permute.xlu0 %v458_v8  ;;  %v20_v9 = vld [vmem:[%s550_s2] sm:$0x1]  ;;  %436 = vset.pattern.permute.xlu1 %v459_v11  ;;  %v26_v15 = vld [vmem:[%s552_s3 + $0x28] sm:$0xff]  ;;  %v24_v17 = vld [vmem:[%s552_s3 + $0x18] sm:$0xff]  ;;  %vm99_vm3 = vcmask 392192   ;;  %vm197_vm4 = vcmask 95232  }
   0x4   :  { %v46_v10 = vsel %vm44_vm0, %v356_v4, 0  ;;  %32 = vperm.xlu0 %434, %v19_v6   ;;  %v18_v13 = vld [vmem:[%s551_s1] sm:$0xf]  ;;  %109 = vperm.xlu1 %436, %v20_v9   ;;  %v23_v18 = vld [vmem:[%s552_s3 + $0x10] sm:$0xff]  ;;  %v22_v19 = vld [vmem:[%s552_s3 + $0x8] sm:$0xff]  ;;  %v119_v4 = vlaneseq  ;;  %v202_v9 = vunpack.c.l.bf16 %v497_v3 }
   0x5   :  { %388 = vmatpush3.bf16.msra.mxu1 %v46_v10  ;;  %v209_v12 = vsel %vm44_vm0, %v363_v7, 0  ;;  %v25_v16 = vld [vmem:[%s552_s3 + $0x20] sm:$0xff]  ;;  %v29_v7 = vunpack.c.l.bf16 %v489_v1 }
   0x6   :  { %409 = vmatpush3.bf16.msra.mxu0 %v209_v12  ;;  %393 = vmatprep.subr.mxu1 %v456_v0  ;;  %v21_v20 = vld [vmem:[%s552_s3] sm:$0xff]  ;;  %v120_v5 = vshrl.u32 %v119_v4, 7 }
   0x7   :  { %414 = vmatprep.subr.mxu0 %v456_v0 }
   0x8   :  { %390 = vmatmul.mubr.msk.bf16.vlgmr.msra.gmra.mxu1 %vm40_vm2, %v18_v13  ;;  %435 = vset.pattern.permute.xlu0 %v460_v14 }
   0x9   :  { %411 = vmatmul.mubr.msk.bf16.vlgmr.msra.gmra.mxu0 %vm40_vm2, %v18_v13  ;;  %95 = vperm.xlu0 %435, %v19_v6   ;;  %v121_v6 = vsub.s32 0, %v120_v5 }
   0xa   :  { %405 = vmatprep.mubr.msk.f32.mxu1 %vm457_vm1, %v456_v0  ;;  %426 = vmatprep.mubr.msk.f32.mxu0 %vm457_vm1, %v456_v0 }
   0xb   :  { %394 = vmatpush3.msra.mxu1 %v26_v15  ;;  %415 = vmatpush3.msra.mxu0 %v26_v15 }
   0xc   :  { %395 = vmatprep.subr.mxu1 %v456_v0  ;;  %416 = vmatprep.subr.mxu0 %v456_v0 }
   0xd   :  { %437 = vset.pattern.permute.xlu0 %v459_v11  ;;  %396 = vmatpush3.msra.mxu1 %v25_v16 }
   0xe   :  { %417 = vmatpush3.msra.mxu0 %v25_v16  ;;  %397 = vmatprep.subr.mxu1 %v456_v0 }
   0xf   :  { %418 = vmatprep.subr.mxu0 %v456_v0  ;;  %398 = vmatpush3.msra.mxu1 %v24_v17 }
  0x10   :  { %419 = vmatpush3.msra.mxu0 %v24_v17  ;;  %399 = vmatprep.subr.mxu1 %v456_v0 }
  0x11   :  { %420 = vmatprep.subr.mxu0 %v456_v0  ;;  %400 = vmatpush3.msra.mxu1 %v23_v18 }
  0x12   :  { %421 = vmatpush3.msra.mxu0 %v23_v18  ;;  %401 = vmatprep.subr.mxu1 %v456_v0 }
  0x13   :  { %422 = vmatprep.subr.mxu0 %v456_v0  ;;  %402 = vmatpush3.msra.mxu1 %v22_v19 }
  0x14   :  { %423 = vmatpush3.msra.mxu0 %v22_v19  ;;  %403 = vmatprep.subr.mxu1 %v456_v0 }
  0x15   :  { %424 = vmatprep.subr.mxu0 %v456_v0  ;;  %404 = vmatpush3.msra.mxu1 %v21_v20 }
  0x16   :  { %425 = vmatpush3.msra.mxu0 %v21_v20 }
  0x7f   :  { %v33_v21 = vpop.permute.xlu0 %32  ;;  %v110_v54 = vpop.permute.xlu1 %109 }
  0x84   :  { %v96_v38 = vpop.permute.xlu0 %95 }
  0xc8   :  { %v82_v22 = vpop.f32.mrf.mxu1 }
  0xc9   :  { %v83_v23 = vadd.f32 %v82_v22, %v33_v21  ;;  %v245_v24 = vpop.f32.mrf.mxu0 }
  0xca   :  { %v246_v25 = vadd.f32 %v245_v24, %v33_v21  ;;  %v391_v26 = vpop.f32.mrf.mxu1 }
  0xcb   :  { %v358_v27 = vmul.f32 -1.442695, %v83_v23  ;;  %v412_v28 = vpop.f32.mrf.mxu0 }
  0xcc   :  { %v365_v29 = vmul.f32 -1.442695, %v246_v25  ;;  %v85_v30 = vpop.f32.mrf.mxu1 }
  0xcd   :  { %440 = vpow2.f32 %v358_v27  ;;  %v248_v31 = vpop.f32.mrf.mxu0 }
  0xce   :  { %442 = vpow2.f32 %v365_v29  ;;  %v392_v32 = vpop.f32.mrf.mxu1 }
  0xcf   :  { %v413_v33 = vpop.f32.mrf.mxu0 }
  0xda   :  { %v441_v34 = vpop.eup %440 }
  0xdb   :  { %v443_v35 = vpop.eup %442  ;;  %v91_v36 = vadd.f32 1.0, %v441_v34 }
  0xdc   :  { %v254_v37 = vadd.f32 1.0, %v443_v35 }
  0xdd   :  { %444 = vrcp.f32 %v91_v36 }
  0xde   :  { %446 = vrcp.f32 %v254_v37 }
  0xea   :  { %v445_v39 = vpop.eup %444 }
  0xeb   :  { %v447_v40 = vpop.eup %446  ;;  %v98_v41 = vmul.f32 %v445_v39, %v96_v38 }
  0xec   :  { %v257_v42 = vmul.f32 %v447_v40, %v96_v38 }
  0xed   :  { %v100_v43 = vsel %vm99_vm3, %v98_v41, 0.0 }
  0xee   :  { %v101_v44 = vrot.slane %v100_v43, 4  ;;  %v258_v45 = vsel %vm99_vm3, %v257_v42, 0.0 }
  0xef   :  { %v259_v46 = vrot.slane %v258_v45, 4 }
  0xf0   :  { %v102_v47 = vadd.f32 %v101_v44, %v100_v43 }
  0xf1   :  { %v260_v48 = vadd.f32 %v259_v46, %v258_v45 }
  0xf2   :  { %v103_v49 = vrot.slane %v102_v47, 2 }
  0xf3   :  { %v261_v50 = vrot.slane %v260_v48, 2 }
  0xf4   :  { %v104_v51 = vadd.f32 %v103_v49, %v102_v47 }
  0xf5   :  { %v262_v52 = vadd.f32 %v261_v50, %v260_v48 }
  0xf6   :  { %v105_v53 = vrot.slane %v104_v51, 1 }
  0xf7   :  { %v263_v55 = vrot.slane %v262_v52, 1 }
  0xf8   :  { %v106_v56 = vadd.f32 %v105_v53, %v104_v51 }
  0xf9   :  { %v264_v57 = vadd.f32 %v263_v55, %v262_v52 }
  0xfa   :  { %v112_v58 = vadd.f32 %v110_v54, %v106_v56 }
  0xfb   :  { %v265_v59 = vadd.f32 %v264_v57, %v110_v54 }
  0xfc   :  { %v359_v60 = vmul.f32 -1.442695, %v112_v58 }
  0xfd   :  { %v366_v61 = vmul.f32 -1.442695, %v265_v59 }
  0xfe   :  { %448 = vpow2.f32 %v359_v60 }
  0xff   :  { %450 = vpow2.f32 %v366_v61 }
 0x10b   :  { %v449_v62 = vpop.eup %448 }
 0x10c   :  { %v451_v63 = vpop.eup %450  ;;  %v116_v0 = vadd.f32 1.0, %v449_v62 }
 0x10d   :  { %v269_v2 = vadd.f32 1.0, %v451_v63 }
 0x10e   :  { %452 = vrcp.f32 %v116_v0 }
 0x10f   :  { %454 = vrcp.f32 %v269_v2 }
 0x11b   :  { %v453_v8 = vpop.eup %452 }
 0x11c   :  { %v455_v10 = vpop.eup %454  ;;  %v122_v11 = vrot.slane %v453_v8, %v121_v6 }
 0x11d   :  { %v275_v12 = vrot.slane %v455_v10, %v121_v6 }
 0x11e   :  { %v123_v13 = vmul.f32 %v122_v11, %v29_v7 }
 0x11f   :  { %v276_v14 = vmul.f32 %v275_v12, %v202_v9 }
 0x120   :  { %406 = vmatmul.mubr.msk.f32.vlgmr.msra.gmra.mxu1 %vm99_vm3, %v123_v13 }
 0x121   :  { %427 = vmatmul.mubr.msk.f32.vlgmr.msra.gmra.mxu0 %vm99_vm3, %v276_v14 }
 0x1e0   :  { %v193_v15 = vpop.f32.mrf.mxu1 }
 0x1e1   :  { %198 = vst.msk [vmem:[%s553_s4] sm:$0x3f] %vm197_vm4, %v193_v15  ;;  %v346_v16 = vpop.f32.mrf.mxu0 }
 0x1e2   :  { %368 = vst.msk [vmem:[%s553_s4 + $0x8] sm:$0x3f] %vm197_vm4, %v346_v16  ;;  %v407_v1 = vpop.f32.mrf.mxu1 }
 0x1e3   :  { %v428_v3 = vpop.f32.mrf.mxu0 }

</bundles_post_ra>
